<compile_context>
chip_gen: v6e
topology: v6e:2x2x1
jax: 0.10.0
libtpu: 0.0.40
codegen_flags: <defaults>
</compile_context>

<pallas_src>
import functools

import jax
import jax.numpy as jnp
from jax.experimental import pallas as pl
from jax.experimental.pallas import tpu as pltpu


def _round_up(x, m):
    return (x + m - 1) // m * m


def _device_vmem_bytes():
    """Physical VMEM per core (v5e/v6e: 128 MiB, v7x: 64 MiB). Conservative fallback."""
    try:
        return int(getattr(pltpu.get_tpu_info(), "vmem_capacity_bytes", 64 << 20))
    except Exception:
        return 64 << 20


def _vmem_limit_bytes(footprint, vmem_cap):
    """Scoped-VMEM request: footprint + margin, never above physical VMEM - headroom."""
    hi = max(vmem_cap - (8 << 20), 24 << 20)
    return int(min(max(footprint + (4 << 20), 32 << 20), hi))


def _layernorm_f32(x, gamma, *, d_in, needs_mask):
    """LayerNorm over the (lane-padded) last dim in f32.

    LayerNorm beta is folded into the linear bias outside the kernel, so only the
    gamma scale is applied here. Padded lanes are zero-filled; they are exact for
    the mean and masked out of the variance so LN matches the true D_in.
    """
    x = x.astype(jnp.float32)
    inv_d = 1.0 / d_in
    mean = jnp.sum(x, axis=-1, keepdims=True) * inv_d      # zero padding -> sum exact
    centered = x - mean
    if needs_mask:
        lane = jax.lax.broadcasted_iota(jnp.int32, x.shape, dimension=1)
        centered = jnp.where(lane < d_in, centered, 0.0)
    var = jnp.sum(centered * centered, axis=-1, keepdims=True) * inv_d
    return centered * jax.lax.rsqrt(var + 1e-5) * gamma.astype(jnp.float32)


def _ln_linear_resident_kernel(x_ref, gamma_ref, w_ref, fb_ref, o_ref,
                               *, d_in, needs_mask):
    """1-D grid over row tiles; the full (D_in_p, D_out_p) weight stays VMEM-resident.

    x_ref     : (tm, D_in_p)       token features (zero lane-padded past d_in)
    gamma_ref : (1, D_in_p)        LayerNorm weight
    w_ref     : (D_in_p, D_out_p)  full Linear weight, (in x out) layout
    fb_ref    : (1, D_out_p)       fused bias (beta @ W + fc_bias)
    o_ref     : (tm, D_out_p)      output tile
    """
    xn = _layernorm_f32(x_ref[...], gamma_ref[...], d_in=d_in, needs_mask=needs_mask)
    y = jnp.dot(xn.astype(w_ref.dtype), w_ref[...],
                preferred_element_type=jnp.float32)
    o_ref[...] = (y + fb_ref[...].astype(jnp.float32)).astype(o_ref.dtype)


def _ln_linear_tiled_kernel(x_ref, gamma_ref, w_ref, fb_ref, o_ref, xn_ref,
                            *, d_in, needs_mask):
    """2-D grid (row tiles x output N-tiles) for weights too large to keep resident.

    LayerNorm runs only once per row tile (at j == 0) into a VMEM scratch already
    cast to the weight dtype; every N-tile reuses it (j axis is "arbitrary").
    """
    @pl.when(pl.program_id(1) == 0)
    def _():
        xn = _layernorm_f32(x_ref[...], gamma_ref[...],
                            d_in=d_in, needs_mask=needs_mask)
        xn_ref[...] = xn.astype(xn_ref.dtype)

    y = jnp.dot(xn_ref[...], w_ref[...], preferred_element_type=jnp.float32)
    o_ref[...] = (y + fb_ref[...].astype(jnp.float32)).astype(o_ref.dtype)


def _maybe_buffered_spec(block_shape, index_map, buffer_count):
    """BlockSpec with an optional deeper pipeline (v5e weight streaming)."""
    if buffer_count > 2:
        try:
            return pl.BlockSpec(block_shape, index_map,
                                pipeline_mode=pl.Buffered(buffer_count))
        except Exception:
            pass  # fall back to default double buffering on older JAX
    return pl.BlockSpec(block_shape, index_map)


def prepare_mlp_params(ln_weight, ln_bias, fc_weight, fc_bias, *,
                       param_dtype=jnp.bfloat16):
    """One-time parameter prep (do NOT call per forward):
       - transpose PyTorch (out, in) weight to (in, out)
       - fold LayerNorm beta into the linear bias:
         (xn*gamma + beta) @ W + b == (xn*gamma) @ W + (beta @ W + b)
       - pad everything to 128-lane multiples
       - cast the weight to param_dtype (bf16 default = MXU fast path;
         pass jnp.float32 explicitly for the slow full-precision path)."""
    ln_weight = jnp.asarray(ln_weight, jnp.float32)
    ln_bias = jnp.asarray(ln_bias, jnp.float32)
    w = jnp.asarray(fc_weight, jnp.float32).T                      # (d_in, d_out)
    fused_bias = ln_bias @ w + jnp.asarray(fc_bias, jnp.float32)   # (d_out,) in f32
    d_in, d_out = int(w.shape[0]), int(w.shape[1])
    d_in_p, d_out_p = _round_up(d_in, 128), _round_up(d_out, 128)

    w = jnp.pad(w, ((0, d_in_p - d_in), (0, d_out_p - d_out)))
    gamma = jnp.pad(ln_weight, (0, d_in_p - d_in)).reshape(1, d_in_p)
    bias = jnp.pad(fused_bias, (0, d_out_p - d_out)).reshape(1, d_out_p)
    if param_dtype is not None:
        w = w.astype(param_dtype)
    return {"gamma": gamma, "w": w, "bias": bias, "d_in": d_in, "d_out": d_out}


def mlp_output_layer(x, prepared, *, tm=512, max_resident_weight_bytes=12 << 20,
                     weight_buffers=2):
    """Apply Mlp (LayerNorm + Linear) to x of shape [B, T, D_in].

    tm: row-tile size (tokens per grid step). 512 amortizes per-step overhead;
        it is shrunk automatically for small inputs / VMEM budget and split so
        there are at least two row tiles (keeps both v7x TensorCores busy).
    max_resident_weight_bytes: if the padded weight fits under this (and the VMEM
        budget), the grid collapses to 1-D and the weight stays resident.
    weight_buffers: pipeline depth for weight N-tiles in the tiled path; set 3 on
        v5e to hide weight-tile DMA jitter (marginal on v6e/v7x).
    """
    B, T, d_in = x.shape
    if d_in != prepared["d_in"]:
        raise ValueError(f"feature dim {d_in} != prepared d_in {prepared['d_in']}")
    w, gamma, bias = prepared["w"], prepared["gamma"], prepared["bias"]
    d_in_p, d_out_p = int(w.shape[0]), int(w.shape[1])
    d_out = prepared["d_out"]
    M = B * T

    x_isz = jnp.dtype(x.dtype).itemsize
    w_isz = jnp.dtype(w.dtype).itemsize
    o_isz = x_isz                       # output keeps x.dtype
    sub = 8 if x_isz >= 4 else 16

    # ---- row-tile size: never larger than needed, >= 2 tiles when possible. ----
    tm = max(sub, min(_round_up(tm, sub), _round_up(M, sub)))
    if M > sub and pl.cdiv(M, tm) < 2:
        tm = max(sub, _round_up(pl.cdiv(M, 2), sub))

    # ---- VMEM budget (clamped to the actual device; v7x has only 64 MiB). ----
    vmem_cap = _device_vmem_bytes()
    budget = max(vmem_cap - (16 << 20), 24 << 20)

    def resident_bytes(tm_):
        return (2 * tm_ * d_in_p * x_isz            # x tile, double-buffered
                + 2 * d_in_p * d_out_p * w_isz      # resident weight (2 bufs, cons.)
                + 2 * tm_ * d_out_p * o_isz         # output tile, double-buffered
                + 2 * (d_in_p + d_out_p) * 4        # gamma / fused bias
                + 3 * tm_ * d_in_p * 4              # f32 LN temporaries
                + tm_ * d_out_p * 4)                # f32 matmul accumulator

    def tiled_bytes(tm_, tn_, wbuf_):
        return (2 * tm_ * d_in_p * x_isz
                + wbuf_ * d_in_p * tn_ * w_isz      # weight N-tile pipeline
                + 2 * tm_ * tn_ * o_isz
                + 2 * (d_in_p + tn_) * 4
                + tm_ * d_in_p * w_isz              # x_norm scratch
                + 3 * tm_ * d_in_p * 4              # f32 LN temporaries
                + tm_ * tn_ * 4)                    # f32 matmul accumulator

    use_resident = (d_in_p * d_out_p * w_isz
                    <= min(max_resident_weight_bytes, budget // 3))
    if use_resident:
        while resident_bytes(tm) > budget and tm > sub:
            tm = max(sub, _round_up(tm // 2, sub))
        use_resident = resident_bytes(tm) <= budget

    # ---- activation: lane-pad only if D_in is not a 128 multiple; never pad M. ----
    needs_mask = (d_in_p != d_in)
    x2d = x.reshape(M, d_in)
    if needs_mask:
        x2d = jnp.pad(x2d, ((0, 0), (0, d_in_p - d_in)))

    if use_resident:
        footprint = resident_bytes(tm)
        out2d = pl.pallas_call(
            functools.partial(_ln_linear_resident_kernel,
                              d_in=d_in, needs_mask=needs_mask),
            out_shape=jax.ShapeDtypeStruct((M, d_out_p), x.dtype),
            grid_spec=pltpu.PrefetchScalarGridSpec(
                num_scalar_prefetch=0,
                grid=(pl.cdiv(M, tm),),
                in_specs=[
                    pl.BlockSpec((tm, d_in_p), lambda i: (i, 0)),        # x row tile
                    pl.BlockSpec((1, d_in_p), lambda i: (0, 0)),         # ln gamma
                    pl.BlockSpec((d_in_p, d_out_p), lambda i: (0, 0)),   # weight (resident)
                    pl.BlockSpec((1, d_out_p), lambda i: (0, 0)),        # fused bias
                ],
                out_specs=pl.BlockSpec((tm, d_out_p), lambda i: (i, 0)),
            ),
            compiler_params=pltpu.CompilerParams(
                dimension_semantics=("parallel",),
                vmem_limit_bytes=_vmem_limit_bytes(footprint, vmem_cap)),
        )(x2d, gamma, w, bias)
    else:
        # ---- tiled path: pick a lane-dense N-tile that divides d_out_p. ----
        tn = 512 if d_out_p % 512 == 0 else (256 if d_out_p % 256 == 0 else 128)
        wbuf = max(2, int(weight_buffers))
        while tiled_bytes(tm, tn, wbuf) > budget:
            if wbuf > 2:
                wbuf = 2
            elif tn > 128:
                tn //= 2
            elif tm > sub:
                tm = max(sub, _round_up(tm // 2, sub))
            else:
                break
        footprint = tiled_bytes(tm, tn, wbuf)
        out2d = pl.pallas_call(
            functools.partial(_ln_linear_tiled_kernel,
                              d_in=d_in, needs_mask=needs_mask),
            out_shape=jax.ShapeDtypeStruct((M, d_out_p), x.dtype),
            grid_spec=pltpu.PrefetchScalarGridSpec(
                num_scalar_prefetch=0,
                grid=(pl.cdiv(M, tm), d_out_p // tn),
                in_specs=[
                    pl.BlockSpec((tm, d_in_p), lambda i, j: (i, 0)),     # x row tile
                    pl.BlockSpec((1, d_in_p), lambda i, j: (0, 0)),      # ln gamma
                    _maybe_buffered_spec((d_in_p, tn),
                                         lambda i, j: (0, j), wbuf),     # weight N-tile
                    pl.BlockSpec((1, tn), lambda i, j: (0, j)),          # fused bias tile
                ],
                out_specs=pl.BlockSpec((tm, tn), lambda i, j: (i, j)),
                scratch_shapes=[pltpu.VMEM((tm, d_in_p), w.dtype)],      # cached x_norm
            ),
            compiler_params=pltpu.CompilerParams(
                dimension_semantics=("parallel", "arbitrary"),
                vmem_limit_bytes=_vmem_limit_bytes(footprint, vmem_cap)),
        )(x2d, gamma, w, bias)

    if d_out_p != d_out:
        out2d = out2d[:, :d_out]
    return out2d.reshape(B, T, d_out)


def audio_encoder_with_mlp_output(x, prepared_params, **mlp_kwargs):
    """Forward pass of AudioEncoderWithMlpOutput.

    x: [B, T, encoder_output_dim] encoder features (encoder is abstract; see
       TODO(synk) above — treated as identity).
    """
    feats = x                      # encoder(x) -> identity stand-in
    return mlp_output_layer(feats, prepared_params, **mlp_kwargs)


def init_params(key, encoder_output_dim, output_dim):
    """Deterministic init matching ModelBase._init_weights:
       LayerNorm: weight=1, bias=0; Linear: xavier_uniform weight, zero bias."""
    fan_in, fan_out = encoder_output_dim, output_dim
    bound = jnp.sqrt(6.0 / (fan_in + fan_out))
    fc_weight = jax.random.uniform(
        key, (output_dim, encoder_output_dim),
        minval=-bound, maxval=bound, dtype=jnp.float32)
    return {
        "ln_weight": jnp.ones((encoder_output_dim,), jnp.float32),
        "ln_bias": jnp.zeros((encoder_output_dim,), jnp.float32),
        "fc_weight": fc_weight,
        "fc_bias": jnp.zeros((output_dim,), jnp.float32),
    }


if __name__ == "__main__":
    key = jax.random.PRNGKey(0)
    k_x1, k_w1, k_x2, k_w2 = jax.random.split(key, 4)

    # ------ Check 1: default bf16-weight hot path, resident-weight kernel ------
    B, T, D_ENC, D_OUT = 2, 8, 32, 16
    x = jax.random.normal(k_x1, (B, T, D_ENC), dtype=jnp.float32)
    raw = init_params(k_w1, D_ENC, D_OUT)
    prepared = prepare_mlp_params(raw["ln_weight"], raw["ln_bias"],
                                  raw["fc_weight"], raw["fc_bias"])   # bf16 default
    out = jax.block_until_ready(audio_encoder_with_mlp_output(x, prepared))
    assert out.shape == (B, T, D_OUT)

    mean = jnp.mean(x, axis=-1, keepdims=True)
    var = jnp.mean((x - mean) ** 2, axis=-1, keepdims=True)
    xn_g = (x - mean) / jnp.sqrt(var + 1e-5) * raw["ln_weight"]
    w_t = raw["fc_weight"].T
    ref = (xn_g.astype(jnp.bfloat16).astype(jnp.float32)
           @ w_t.astype(jnp.bfloat16).astype(jnp.float32)
           + (raw["ln_bias"] @ w_t + raw["fc_bias"]))
    err1 = float(jnp.max(jnp.abs(out - ref)))
    assert jnp.allclose(out, ref, atol=1e-3, rtol=1e-3), err1

    # ------ Check 2: forced tiled path (N-tiles + LN scratch), f32 weights, ------
    # ------ ragged token count and non-128-multiple dims, nonzero LN beta ------
    B2, T2, D2, O2 = 2, 9, 160, 300
    x2 = jax.random.normal(k_x2, (B2, T2, D2), dtype=jnp.float32)
    raw2 = init_params(k_w2, D2, O2)
    raw2["ln_weight"] = 1.0 + 0.05 * jnp.cos(jnp.arange(D2, dtype=jnp.float32))
    raw2["ln_bias"] = 0.1 * jnp.sin(jnp.arange(D2, dtype=jnp.float32))
    prepared2 = prepare_mlp_params(raw2["ln_weight"], raw2["ln_bias"],
                                   raw2["fc_weight"], raw2["fc_bias"],
                                   param_dtype=jnp.float32)
    out2 = jax.block_until_ready(
        mlp_output_layer(x2, prepared2, max_resident_weight_bytes=0))
    assert out2.shape == (B2, T2, O2)

    mean2 = jnp.mean(x2, axis=-1, keepdims=True)
    var2 = jnp.mean((x2 - mean2) ** 2, axis=-1, keepdims=True)
    xn2 = (x2 - mean2) / jnp.sqrt(var2 + 1e-5) * raw2["ln_weight"] + raw2["ln_bias"]
    ref2 = xn2 @ raw2["fc_weight"].T + raw2["fc_bias"]
    err2 = float(jnp.max(jnp.abs(out2 - ref2)))
    assert jnp.allclose(out2, ref2, atol=3e-4, rtol=3e-4), err2

    print("KERNEL_OK")
</pallas_src>

<mosaic_0001>
module attributes {stable_mosaic.version = 11 : i64} {
  func.func @_ln_linear_resident_kernel(%arg0: i32, %arg1: memref<8x128xf32, #tpu.memory_space<vmem>>, %arg2: memref<1x128xf32, #tpu.memory_space<vmem>>, %arg3: memref<128x128xbf16, #tpu.memory_space<vmem>>, %arg4: memref<1x128xf32, #tpu.memory_space<vmem>>, %arg5: memref<8x128xf32, #tpu.memory_space<vmem>>) attributes {dimension_semantics = [#tpu.dimension_semantics<parallel>], iteration_bounds = array<i64: 2>, scalar_prefetch = 0 : i64, scratch_operands = 0 : i64, tpu.core_type = #tpu.core_type<tc>, window_params = [{transform_indices = @transform_0, window_bounds = array<i64: 8, 128>}, {pipeline_mode = #tpu.pipeline_mode<synchronous>, transform_indices = @transform_1, window_bounds = array<i64: 1, 128>}, {pipeline_mode = #tpu.pipeline_mode<synchronous>, transform_indices = @transform_2, window_bounds = array<i64: 128, 128>}, {pipeline_mode = #tpu.pipeline_mode<synchronous>, transform_indices = @transform_3, window_bounds = array<i64: 1, 128>}, {transform_indices = @transform_4, window_bounds = array<i64: 8, 128>}]} {
    %c0 = arith.constant 0 : index
    %c0_0 = arith.constant 0 : index
    %0 = vector.load %arg1[%c0, %c0_0] : memref<8x128xf32, #tpu.memory_space<vmem>>, vector<8x128xf32>
    %c0_1 = arith.constant 0 : index
    %c0_2 = arith.constant 0 : index
    %1 = vector.load %arg2[%c0_1, %c0_2] : memref<1x128xf32, #tpu.memory_space<vmem>>, vector<1x128xf32>
    %cst = arith.constant dense<0.000000e+00> : vector<8xf32>
    %2 = vector.multi_reduction <add>, %0, %cst [1] : vector<8x128xf32> to vector<8xf32>
    %3 = vector.shape_cast %2 : vector<8xf32> to vector<8x1xf32>
    %cst_3 = arith.constant 3.125000e-02 : f32
    %4 = vector.broadcast %cst_3 : f32 to vector<8x1xf32>
    %5 = arith.mulf %3, %4 : vector<8x1xf32>
    %6 = vector.broadcast %5 : vector<8x1xf32> to vector<8x128xf32>
    %7 = arith.subf %0, %6 : vector<8x128xf32>
    %8 = tpu.iota {dimensions = array<i32: 1>} : vector<8x128xi32>
    %c32_i32 = arith.constant 32 : i32
    %9 = vector.broadcast %c32_i32 : i32 to vector<8x128xi32>
    %10 = arith.cmpi slt, %8, %9 : vector<8x128xi32>
    %cst_4 = arith.constant 0.000000e+00 : f32
    %11 = vector.broadcast %cst_4 : f32 to vector<8x128xf32>
    %12 = arith.select %10, %7, %11 : vector<8x128xi1>, vector<8x128xf32>
    %13 = arith.mulf %12, %12 : vector<8x128xf32>
    %cst_5 = arith.constant dense<0.000000e+00> : vector<8xf32>
    %14 = vector.multi_reduction <add>, %13, %cst_5 [1] : vector<8x128xf32> to vector<8xf32>
    %15 = vector.shape_cast %14 : vector<8xf32> to vector<8x1xf32>
    %cst_6 = arith.constant 3.125000e-02 : f32
    %16 = vector.broadcast %cst_6 : f32 to vector<8x1xf32>
    %17 = arith.mulf %15, %16 : vector<8x1xf32>
    %cst_7 = arith.constant 9.99999974E-6 : f32
    %18 = vector.broadcast %cst_7 : f32 to vector<8x1xf32>
    %19 = arith.addf %17, %18 : vector<8x1xf32>
    %20 = math.rsqrt %19 : vector<8x1xf32>
    %21 = vector.broadcast %20 : vector<8x1xf32> to vector<8x128xf32>
    %22 = arith.mulf %12, %21 : vector<8x128xf32>
    %23 = vector.broadcast %1 : vector<1x128xf32> to vector<8x128xf32>
    %24 = arith.mulf %22, %23 : vector<8x128xf32>
    %25 = arith.truncf %24 : vector<8x128xf32> to vector<8x128xbf16>
    %c0_8 = arith.constant 0 : index
    %c0_9 = arith.constant 0 : index
    %26 = vector.load %arg3[%c0_8, %c0_9] : memref<128x128xbf16, #tpu.memory_space<vmem>>, vector<128x128xbf16>
    %cst_10 = arith.constant dense<0.000000e+00> : vector<8x128xf32>
    %27 = tpu.matmul %25, %26, %cst_10 {dimension_numbers = #tpu.dot_dimension_numbers<[1], [0], [0], [1], [0, 0, 1, 1], [], []>} : vector<8x128xbf16>, vector<128x128xbf16>, vector<8x128xf32> -> vector<8x128xf32>
    %c0_11 = arith.constant 0 : index
    %c0_12 = arith.constant 0 : index
    %28 = vector.load %arg4[%c0_11, %c0_12] : memref<1x128xf32, #tpu.memory_space<vmem>>, vector<1x128xf32>
    %29 = vector.broadcast %28 : vector<1x128xf32> to vector<8x128xf32>
    %30 = arith.addf %27, %29 : vector<8x128xf32>
    %c0_13 = arith.constant 0 : index
    %c0_14 = arith.constant 0 : index
    %31 = vector.load %arg5[%c0_13, %c0_14] : memref<8x128xf32, #tpu.memory_space<vmem>>, vector<8x128xf32>
    tpu.vector_store %arg5[%c0_13, %c0_14], %30 {strides = array<i32>} : memref<8x128xf32, #tpu.memory_space<vmem>>, vector<8x128xf32>,
    return
  }
  func.func @transform_0(%arg0: i32) -> (i32, i32) {
    %c0_i32 = arith.constant 0 : i32
    %c0_i32_0 = arith.constant 0 : i32
    return %arg0, %c0_i32 : i32, i32
  }
  func.func @transform_1(%arg0: i32) -> (i32, i32) {
    %c0_i32 = arith.constant 0 : i32
    %c0_i32_0 = arith.constant 0 : i32
    %c0_i32_1 = arith.constant 0 : i32
    return %c0_i32, %c0_i32_0 : i32, i32
  }
  func.func @transform_2(%arg0: i32) -> (i32, i32) {
    %c0_i32 = arith.constant 0 : i32
    %c0_i32_0 = arith.constant 0 : i32
    %c0_i32_1 = arith.constant 0 : i32
    return %c0_i32, %c0_i32_0 : i32, i32
  }
  func.func @transform_3(%arg0: i32) -> (i32, i32) {
    %c0_i32 = arith.constant 0 : i32
    %c0_i32_0 = arith.constant 0 : i32
    %c0_i32_1 = arith.constant 0 : i32
    return %c0_i32, %c0_i32_0 : i32, i32
  }
  func.func @transform_4(%arg0: i32) -> (i32, i32) {
    %c0_i32 = arith.constant 0 : i32
    %c0_i32_0 = arith.constant 0 : i32
    return %arg0, %c0_i32 : i32, i32
  }
}

</mosaic_0001>

<bundles_post_ra>
// kernel: tpu_custom_call.1
= control target key start
LH: loop header
LB: loop body
LE: loop exit
PB: predicated region body
PF: predicated region fallthrough
CT: control target
= control target key end

     0   :  { %9 = vsyncpa [#allocation3], 0  ;;  %s916_s0 = inlined_call_operand.hbm [shape: f32[16,128], index: 0, kind: input, shape index: {}]   ;;  %s917_s1 = inlined_call_operand.vmem [shape: f32[1,128], index: 1, kind: input, shape index: {}]   ;;  %s918_s2 = inlined_call_operand.hbm [shape: bf16[128,128], index: 2, kind: input, shape index: {}]   ;;  %s919_s3 = inlined_call_operand.vmem [shape: f32[1,128], index: 3, kind: input, shape index: {}]   ;;  %s920_s4 = inlined_call_operand.hbm [shape: f32[16,128], index: 4, kind: output, shape index: {}]  }
   0x1   :  { %11 = vsyncpa [#allocation3 + $0x1], 0 }
   0x2   :  { %12 = vsyncpa [#allocation6], 0 }
   0x3   :  { %13 = vsyncpa [#allocation4], 0 }
   0x4   :  { %15 = vsyncpa [#allocation4 + $0x1], 0  ;;  %s740_s15 = smov 0   ;;  %s742_s16 = smov 0  }
   0x5   :  { %s744_s17 = smov 0   ;;  %s746_s18 = smov 0  }
   0x6 LB: > { %s761_s19 = sadd.s32 4294967295, %s706_s18   ;;  %s460_s20 = sadd.s32 4294967294, %s706_s18   ;;  %s706_s18 = sphi %s746_s18, %s942_s18   ;;  %s702_s17 = sphi %s744_s17, %s941_s17   ;;  %s698_s16 = sphi %s742_s16, %s940_s16   ;;  %s694_s15 = sphi %s740_s15, %s939_s15  }
   0x7   : > { %p41_p0 = scmp.ne.s32.totalorder %s698_s16, %s694_s15  ;;  %p921_p1 = scmp.eq.s32.totalorder %s761_s19, 0 }
   0x8   : > { %p134_p3 = scmp.eq.s32.totalorder %s460_s20, 1  ;;  %p461_p5 = scmp.ge.s32.totalorder %s706_s18, 1 }
   0x9   : > { %p770_p4 = por %p921_p1, %p41_p0  ;;  %p141_p7 = scmp.lt.s32.totalorder %s706_s18, 3 }
   0xa   : > { %p775_p6 = por %p134_p3, %p41_p0  ;;  %s708_s24 = smov [#allocation5]  }
   0xb   : > { %s925_s21 = scalar_select %p770_p4, 1, 0 }
   0xc   : > { %s926_s22 = scalar_select %p775_p6, 1, 0 }
   0xd   : > { %p780_p8 = pnand %p461_p5, %p141_p7  ;;  %s156_s25 = sshll.u32 %s708_s24, 4  ;;  %s157_s25 = int_to_ptr.vmem [resolvable:$true] %s156_s25 }
   0xe   : > { %s794_s27 = sadd.s32 1, %s706_s18   ;;  %s28_s28 = sadd.s32 1, %s702_s17 }
   0xf   : > { %s927_s23 = scalar_select %p780_p8, 1, 0 }
  0x10   : > { %p521_p9 = pneg %p780_p8  ;;  %s25_s29 = ssub.s32 %s706_s18, %s794_s27 }
  0x11   : > { %s595_s30 = scalar_lea.vmem %s157_s25, 1024  ;;  %p603_p5 = scmp.lt.s32.totalorder %s157_s25, %s157_s25 }
  0x12   : > { %p789_p11 = pnand %p521_p9, %p921_p1  ;;  %p596_p13 = scmp.ne.s32.totalorder %s157_s25, %s595_s30 }
  0x13   : > { %p604_p7 = scmp.lt.s32.totalorder %s595_s30, %s595_s30 }
  0x14   : > { %p586_p12 = pneg %p789_p11 }
  0x15   : > { %p605_p10 = por %p604_p7, %p603_p5 }
  0x16   : > { %p598_p0 = pnand %p596_p13, %p586_p12 }
  0x18   : > { %p599_p3 = pneg %p598_p0 }
  0x1a   : > { %p606_p2 = pnand %p605_p10, %p599_p3 }
  0x1c   : > { %609 = shalt.err (!%p606_p2)
}
  0x1d   : > { %s709_s5 = smov 64   ;;  %s710_s6 = smov 4  }
  0x1e   : > { %524 = dma.hbm_to_vmem [thread:$0]  (!%p789_p11), %s918_s2, 1024, %s157_s25, [#allocation6], %s709_s5, %s709_s5, %s710_s6  }
  0x1f   : > { %p26_p9 = scmp.eq.s32.totalorder %s25_s29, 0  ;;  %p35_p12 = scmp.ne.s32.totalorder %s702_s17, %s698_s16 }
  0x20   : > { %p36_p10 = scmp.eq.s32.totalorder %s706_s18, 0  ;;  %p534_p2 = scmp.lt.s32.totalorder %s706_s18, 2 }
  0x21   : > { %s811_s9 = scalar_select %p26_p9, %s702_s17, %s28_s28  }
  0x22   : > { %p37_p13 = por %p36_p10, %p35_p12  ;;  %p929_p0 = scmp.eq.s32.totalorder %s761_s19, 1 }
  0x23   : > { %s173_s11 = sand.u32 1, %s702_s17   ;;  %s465_s12 = sshll.u32 %s706_s18, 7 }
  0x24   : > { %p815_p3 = por %p929_p0, %p35_p12  ;;  %s464_s13 = sshll.u32 %s173_s11, 3 }
  0x25   : > { %s824_s24 = scalar_lea.hbm %s916_s0, %s465_s12  ;;  %s177_s25 = scalar_lea.vmem [#allocation2], %s464_s13 }
  0x26   : > { %s930_s10 = scalar_select %p815_p3, 1, 0 }
  0x27   : > { %s184_s26 = sshll.u32 %s177_s25, 4  ;;  %p826_p11 = pnand %p534_p2, %p37_p13  ;;  %s185_s26 = int_to_ptr.vmem [resolvable:$true] %s184_s26 }
  0x28   : > { %s174_s29 = scalar_lea.sflag [#allocation3], %s173_s11  ;;  %s610_s30 = scalar_lea.hbm %s824_s24, 128 }
  0x29   : > { %p611_p5 = scmp.ne.s32.totalorder %s824_s24, %s610_s30  ;;  %p612_p7 = pneg %p826_p11 }
  0x2a   : > { %s615_s7 = scalar_lea.hbm %s916_s0, 256  ;;  %p616_p10 = scmp.lt.s32.totalorder %s824_s24, %s916_s0 }
  0x2b   : > { %p613_p9 = pnand %p612_p7, %p611_p5  ;;  %p617_p2 = scmp.lt.s32.totalorder %s615_s7, %s610_s30 }
  0x2d   : > { %p614_p12 = pneg %p613_p9  ;;  %p618_p13 = por %p617_p2, %p616_p10 }
  0x2f   : > { %p619_p0 = pnand %p618_p13, %p614_p12 }
  0x31   : > { %622 = shalt.err (!%p619_p0)
}
  0x32   : > { %s623_s13 = scalar_lea.vmem %s185_s26, 128  ;;  %s711_s11 = smov [#allocation2]  }
  0x33   : > { %p624_p1 = scmp.ne.s32.totalorder %s185_s26, %s623_s13  ;;  %s628_s14 = sshll.u32 %s711_s11, 4  ;;  %s629_s14 = int_to_ptr.vmem [resolvable:$false] %s628_s14 }
  0x34   : > { %s630_s20 = scalar_lea.vmem %s629_s14, 256  ;;  %p631_p5 = scmp.lt.s32.totalorder %s185_s26, %s629_s14 }
  0x35   : > { %p626_p6 = pnand %p624_p1, %p612_p7  ;;  %p632_p9 = scmp.lt.s32.totalorder %s630_s20, %s623_s13 }
  0x37   : > { %p627_p3 = pneg %p626_p6  ;;  %p633_p4 = por %p632_p9, %p631_p5 }
  0x39   : > { %p634_p8 = pnand %p633_p4, %p627_p3 }
  0x3b   : > { %637 = shalt.err (!%p634_p8)
}
  0x3c   : > { %528 = dma.hbm_to_vmem [thread:$0]  (!%p826_p11), %s824_s24, 128, %s185_s26, %s174_s29  }
  0x3d   : > { %p932_p12 = scmp.ne.s32.totalorder %s927_s23, 0 }
  0x3e   : > { %s847_s25 = sand.u32 (!%p932_p12), 1, %s698_s16   ;;  %p933_p1 = scmp.ne.s32.totalorder (!%p932_p12), %s925_s21, 0 }
  0x3f   : > { %193 = sbr.rel (%p932_p12) target bundleno = 589 (0x24d), region = 36  ;;  %s467_s30 = sshll.u32 (!%p932_p12), %s847_s25, 3 }
  0x40   : > { %s196_s5 = scalar_lea.sflag (!%p932_p12), [#allocation3], %s847_s25  ;;  %s199_s6 = scalar_lea.vmem (!%p932_p12), [#allocation2], %s467_s30 }
  0x44   : > { %681 = dma.done.wait (%p933_p1), %s196_s5, 128  }
  0x45   : > { %683 = vsyncadd (%p933_p1), %s196_s5, 4294967168  ;;  %p934_p4 = scmp.eq.s32.totalorder %s761_s19, 0 }
  0x47   : > { %685 = dma.done.wait (%p934_p4), [#allocation6], 1024   ;;  %p935_p6 = pmov %p934_p4 }
  0x48   : > { %v229_v0 = vld [vmem:[%s199_s6] sm:$0xff]  ;;  %v712_v2 = vmov 0.0   ;;  %v235_v4 = vlaneseq  ;;  %v576_v11 = vld [vmem:[#allocation5 + $0x28] sm:$0xff]   ;;  %v577_v12 = vld [vmem:[#allocation5 + $0x20] sm:$0xff]   ;;  %vm713_vm1 = vmmov 0   ;;  %s481_s28 = sshll.u32 %s761_s19, 7 }
  0x49   : > { %687 = vsyncadd (%p935_p6), [#allocation6], 4294966272  ;;  %231 = vadd.xlane.f32.xlu0 %v229_v0  ;;  %v574_v1 = vld [vmem:[#allocation5 + $0x38] sm:$0xff]   ;;  %493 = vmatprep.subr.bf16.mxu0 %v712_v2  ;;  %v575_v3 = vld [vmem:[#allocation5 + $0x30] sm:$0xff]   ;;  %s227_s29 = scalar_lea.vmem [#allocation7], %s467_s30  ;;  %s873_s13 = scalar_lea.hbm %s920_s4, %s481_s28 }
  0x4a   : > { %494 = vmatpush3.bf16.msra.mxu0 %v574_v1  ;;  %v236_v5 = vand.u32 127, %v235_v4  ;;  %v578_v13 = vld [vmem:[#allocation5 + $0x18] sm:$0xff]   ;;  %509 = vmatprep.mubr.msk.bf16.mxu0 %vm713_vm1, %v712_v2  ;;  %v579_v14 = vld [vmem:[#allocation5 + $0x10] sm:$0xff]   ;;  %v580_v15 = vld [vmem:[#allocation5 + $0x8] sm:$0xff]   ;;  %s380_s7 = sshll.u32 %s227_s29, 4  ;;  %s367_s11 = scalar_lea.sflag [#allocation4], %s847_s25  ;;  %s875_s7 = int_to_ptr.vmem [resolvable:$true] %s380_s7 }
  0x4b   : > { %495 = vmatprep.subr.bf16.mxu0 %v712_v2  ;;  %v581_v16 = vld [vmem:[#allocation5] sm:$0xff]   ;;  %v470_v21 = vld [vmem:[%s917_s1] ss:$0 sm:$0xff]  ;;  %s638_s19 = scalar_lea.vmem %s875_s7, 128  ;;  %p936_p3 = scmp.ne.s32.totalorder %s930_s10, 0 }
  0x4c   : > { %vm237_vm0 = vcmp.lt.s32.totalorder %v236_v5, 32  ;;  %v471_v25 = vld [vmem:[%s919_s3] ss:$0 sm:$0xff]  ;;  %p639_p8 = scmp.ne.s32.totalorder %s875_s7, %s638_s19  ;;  %s714_s14 = smov [#allocation7]  }
  0x4d   : > { %s642_s20 = sshll.u32 %s714_s14, 4  ;;  %s643_s20 = int_to_ptr.vmem [resolvable:$false] %s642_s20 }
  0x4e   : > { %496 = vmatpush3.bf16.msra.mxu0 %v575_v3  ;;  %p640_p11 = pnand %p639_p8, %p936_p3  ;;  %s644_s30 = scalar_lea.vmem %s643_s20, 256 }
  0x4f   : > { %497 = vmatprep.subr.bf16.mxu0 %v712_v2  ;;  %p645_p10 = scmp.lt.s32.totalorder %s875_s7, %s643_s20  ;;  %p646_p2 = scmp.lt.s32.totalorder %s644_s30, %s638_s19 }
  0x50   : > { %p641_p7 = pneg %p640_p11 }
  0x51   : > { %p647_p13 = por %p646_p2, %p645_p10 }
  0x52   : > { %498 = vmatpush3.bf16.msra.mxu0 %v576_v11 }
  0x53   : > { %499 = vmatprep.subr.bf16.mxu0 %v712_v2  ;;  %p648_p0 = pnand %p647_p13, %p641_p7 }
  0x56   : > { %500 = vmatpush3.bf16.msra.mxu0 %v577_v12 }
  0x57   : > { %501 = vmatprep.subr.bf16.mxu0 %v712_v2 }
  0x5a   : > { %502 = vmatpush3.bf16.msra.mxu0 %v578_v13 }
  0x5b   : > { %503 = vmatprep.subr.bf16.mxu0 %v712_v2 }
  0x5e   : > { %504 = vmatpush3.bf16.msra.mxu0 %v579_v14 }
  0x5f   : > { %505 = vmatprep.subr.bf16.mxu0 %v712_v2 }
  0x62   : > { %506 = vmatpush3.bf16.msra.mxu0 %v580_v15 }
  0x63   : > { %507 = vmatprep.subr.bf16.mxu0 %v712_v2 }
  0x66   : > { %508 = vmatpush3.bf16.msra.mxu0 %v581_v16 }
  0xd2   : > { %v232_v6 = vpop.xlane.xlu0 %231 }
  0xd3   : > { %v233_v7 = vmul.f32 0.03125, %v232_v6 }
  0xd5   : > { %v234_v8 = vsub.f32 %v229_v0, %v233_v7 }
  0xd7   : > { %v238_v9 = vsel %vm237_vm0, %v234_v8, 0.0 }
  0xd8   : > { %v239_v10 = vmul.f32 %v238_v9, %v238_v9 }
  0xda   : > { %240 = vadd.xlane.f32.xlu0 %v239_v10 }
 0x163   : > { %v241_v17 = vpop.xlane.xlu0 %240 }
 0x164   : > { %v242_v18 = vmul.f32 0.03125, %v241_v17 }
 0x166   : > { %v243_v19 = vadd.f32 1e-05, %v242_v18 }
 0x168   : > { %582 = vrsqrt.f32 %v243_v19 }
 0x175   : > { %v583_v20 = vpop.eup %582 }
 0x176   : > { %v245_v22 = vmul.f32 %v583_v20, %v238_v9 }
 0x178   : > { %v252_v23 = vmul.f32 %v470_v21, %v245_v22 }
 0x17a   : > { %v253_v24 = vpack.c.bf16 %v252_v23, %v252_v23 }
 0x17c   : > { %510 = vmatmul.mubr.bf16.vlgmr.msra.gmra.mxu0 %v253_v24 }
 0x23c   : > { %v359_v26 = vpop.f32.mrf.mxu0 }
 0x23d   : > { %v360_v27 = vadd.f32 %v471_v25, %v359_v26 }
 0x23e   : > { %v511_v28 = vpop.f32.mrf.mxu0 }
 0x23f   : > { %365 = vst [vmem:[%s227_s29] sm:$0xff] %v360_v27 }
 0x240   : > { %v362_v29 = vpop.f32.mrf.mxu0 }
 0x241   : > { %651 = shalt.err (!%p648_p0)
}
 0x242   : > { %s652_s5 = scalar_lea.hbm %s873_s13, 128  ;;  %s656_s21 = scalar_lea.hbm %s920_s4, 256 }
 0x243   : > { %p653_p5 = scmp.ne.s32.totalorder %s873_s13, %s652_s5  ;;  %p657_p1 = scmp.lt.s32.totalorder %s873_s13, %s920_s4 }
 0x244   : > { %p658_p4 = scmp.lt.s32.totalorder %s656_s21, %s652_s5 }
 0x245   : > { %p654_p9 = pnand %p653_p5, %p936_p3 }
 0x246   : > { %p659_p6 = por %p658_p4, %p657_p1 }
 0x247   : > { %p655_p12 = pneg %p654_p9 }
 0x249   : > { %p660_p8 = pnand %p659_p6, %p655_p12 }
 0x24b   : > { %663 = shalt.err (!%p660_p8)
}
 0x24c   : > { %519 = dma.vmem_to_hbm [thread:$0]  (%p936_p3), %s875_s7, 128, %s873_s13, %s367_s11   ;;  %v512_v30 = vpop.f32.mrf.mxu0 }
 0x24d PF: > { %s392_s26 = sand.u32 1, %s694_s15   ;;  %p937_p11 = scmp.ne.s32.totalorder %s926_s22, 0 }
 0x24e   : > { %p938_p7 = scmp.ge.s32.totalorder %s706_s18, 2  ;;  %s393_s28 = scalar_lea.sflag [#allocation4], %s392_s26 }
 0x250   : > { %p530_p10 = pnand %p938_p7, %p937_p11 }
 0x252   : > { %p531_p2 = pneg %p530_p10 }
 0x254   : > { %689 = dma.done.wait (%p531_p2), %s393_s28, 128  }
 0x255   : > { %691 = vsyncadd (%p531_p2), %s393_s28, 4294967168  ;;  %p18_p13 = scmp.ge.s32.totalorder %s794_s27, 4   ;;  %s939_s15 = smov %s698_s16 }
 0x256   : > { %s940_s16 = smov %s702_s17  ;;  %s941_s17 = smov %s811_s9 }
 0x257   : > { %s942_s18 = smov %s794_s27  ;;  %20 = sbr.rel (!%p18_p13) target bundleno = 6 (0x6), region = 85 }
 0x25c   :  { %398 = vsyncpa [#allocation3], 1 }
 0x25d   :  { %400 = vsyncpa [#allocation3 + $0x1], 1 }
 0x25e   :  { %401 = vsyncpa [#allocation6], 1 }
 0x25f   :  { %402 = vsyncpa [#allocation4], 1 }
 0x260   :  { %404 = vsyncpa [#allocation4 + $0x1], 1 }

</bundles_post_ra>
